<compile_context>
chip_gen: v7x
topology: tpu7x:2x2x1
jax: 0.10.0
libtpu: 0.0.40
codegen_flags: <defaults>
</compile_context>

<pallas_src>
from typing import NamedTuple

import jax
import jax.numpy as jnp
from jax.experimental import pallas as pl
from jax.experimental.pallas import tpu as pltpu


def _round_up(a: int, b: int) -> int:
    return ((a + b - 1) // b) * b


def _cdiv(a: int, b: int) -> int:
    return -(-a // b)


def _vmem_capacity_bytes() -> int:
    """Physical VMEM per TensorCore; conservative 64 MiB (v7x) fallback."""
    try:
        info = pltpu.get_tpu_info()
        cap = getattr(info, "vmem_capacity_bytes", None)
        if cap:
            return int(cap)
    except Exception:
        pass
    return 64 << 20


class PackedMLP(NamedTuple):
    dims: tuple      # logical feature dims (D0, D1, ..., DL)
    pdims: tuple     # 128-padded feature dims
    params: tuple    # (w0_p, b0_p, w1_p, b1_p, ...) padded, matmul layout (in, out)
    use_bf16: bool


def pack_mlp_params(weights, biases, *, use_bf16_matmul=True) -> PackedMLP:
    """One-time packing: torch-layout (out, in) weights -> padded (in, out) tiles.

    Hoisted out of the forward path so repeated calls do not re-transpose /
    re-pad every parameter in HBM.
    """
    num_layers = len(weights)
    dims = tuple([int(weights[0].shape[1])] + [int(w.shape[0]) for w in weights])
    pdims = tuple(_round_up(d, 128) for d in dims)
    w_dtype = jnp.bfloat16 if use_bf16_matmul else jnp.float32

    params = []
    for i in range(num_layers):
        din, dout = dims[i], dims[i + 1]
        w_t = jnp.asarray(weights[i]).T.astype(jnp.float32)          # (in, out)
        w_p = (jnp.zeros((pdims[i], pdims[i + 1]), jnp.float32)
               .at[:din, :dout].set(w_t).astype(w_dtype))
        b_p = (jnp.zeros((1, pdims[i + 1]), jnp.float32)
               .at[0, :dout].set(jnp.asarray(biases[i]).astype(jnp.float32)))
        params += [w_p, b_p]
    return PackedMLP(dims, pdims, tuple(params), use_bf16_matmul)


def _make_mlp_kernel(num_layers: int, dim_out: int, padded_dim_out: int,
                     apply_softmax: bool, use_bf16: bool):
    """Kernel with refs = (x, w0, b0, w1, b1, ..., out)."""
    act_dtype = jnp.bfloat16 if use_bf16 else jnp.float32
    needs_mask = apply_softmax and (padded_dim_out != dim_out)

    def kernel(*refs):
        x_ref = refs[0]
        o_ref = refs[-1]
        wb = refs[1:-1]

        h = x_ref[...]                      # bf16 (or f32) row tile
        for layer in range(num_layers):
            w_ref = wb[2 * layer]
            b_ref = wb[2 * layer + 1]
            # MXU matmul with f32 accumulation; bias add stays f32.
            y = jnp.dot(h, w_ref[...], preferred_element_type=jnp.float32)
            y = y + b_ref[...]
            if layer < num_layers - 1:
                # ReLU; keep activations in the matmul feed dtype (bf16 on
                # v6e/v7x halves live bytes and vld/vst pressure).
                h = jnp.maximum(y, 0.0).astype(act_dtype)
            else:
                h = y                        # f32 logits for the epilogue

        if apply_softmax:
            if needs_mask:
                # Mask zero-padded output columns so they get zero probability.
                col = jax.lax.broadcasted_iota(jnp.int32, h.shape, 1)
                h = jnp.where(col < dim_out, h, jnp.float32(-1e30))
            m = jnp.max(h, axis=-1, keepdims=True)
            e = jnp.exp(h - m)
            denom = jnp.sum(e, axis=-1, keepdims=True)
            h = e * pl.reciprocal(denom, approx=True)   # EUP slot, ~free

        o_ref[...] = h.astype(o_ref.dtype)

    return kernel


def mlp_forward(x, packed: PackedMLP, *, tm=512):
    """Fused MLP forward. x: (M, D0). Returns softmax(mlp(x), axis=1) if dim_out > 1."""
    M, D0 = x.shape
    dims, pdims, params, use_bf16 = packed
    num_layers = len(params) // 2
    assert D0 == dims[0], f"input dim {D0} != packed dim {dims[0]}"
    dim_out = dims[-1]
    apply_softmax = dim_out > 1

    # ---- row tiling: balanced tiles, >=2 programs so both v7x TCs get work ----
    TM = min(tm, _round_up(M, 8))
    if M >= 16 and _cdiv(M, TM) < 2:
        TM = _round_up(_cdiv(M, 2), 8)
    TM = _round_up(_cdiv(M, _cdiv(M, TM)), 8)      # minimize row-padding waste

    # ---- per-generation VMEM budget -------------------------------------------
    x_bytes = 2 if use_bf16 else 4
    param_bytes = sum(int(p.size) * jnp.dtype(p.dtype).itemsize for p in params)
    max_pd = max(pdims)
    phys = _vmem_capacity_bytes()                   # 64 MiB v7x, 128 MiB v5e/v6e
    cap = max(phys - (12 << 20), 32 << 20)          # leave compiler/scratch headroom

    def footprint(rows: int, param_bufs: int) -> int:
        io = 2 * rows * (pdims[0] * x_bytes + pdims[-1] * 4)   # dbl-buffered x/out
        act = 2 * rows * max_pd * 4                            # live f32 h/y temps
        return param_bufs * param_bytes + io + act + (4 << 20)

    while TM > 8 and footprint(TM, 1) > cap:
        TM = max(8, _round_up(TM // 2, 8))
    # TODO(synk): if param_bytes alone exceeds `cap` (very wide hidden layers on
    # v7x), add a second grid axis tiling the output-feature dim with a VMEM
    # accumulator instead of keeping every layer resident.

    n_tiles = _cdiv(M, TM)
    M_pad = n_tiles * TM

    # ---- pad the activations (lane-dense features; zero pad is exact) ---------
    x_dtype = jnp.bfloat16 if use_bf16 else jnp.float32
    x_p = jnp.zeros((M_pad, pdims[0]), x_dtype).at[:M, :D0].set(x.astype(x_dtype))

    kernel = _make_mlp_kernel(num_layers, dim_out, pdims[-1], apply_softmax, use_bf16)

    flops = sum(2 * M_pad * pdims[i] * pdims[i + 1] for i in range(num_layers))
    transcendentals = M_pad * pdims[-1] if apply_softmax else 0
    bytes_accessed = x_p.size * x_bytes + param_bytes + M_pad * pdims[-1] * 4

    def run(single_buffer_params: bool):
        def param_spec(shape):
            if single_buffer_params:
                # Constant index map -> one resident buffer (no double-buffering).
                return pl.BlockSpec(shape, lambda i: (0, 0),
                                    pipeline_mode=pl.Buffered(1))
            return pl.BlockSpec(shape, lambda i: (0, 0))

        in_specs = [pl.BlockSpec((TM, pdims[0]), lambda i: (i, 0))]
        for li in range(num_layers):
            in_specs.append(param_spec((pdims[li], pdims[li + 1])))
            in_specs.append(param_spec((1, pdims[li + 1])))
        out_spec = pl.BlockSpec((TM, pdims[-1]), lambda i: (i, 0))

        vmem_limit = int(min(cap, max(footprint(TM, 1 if single_buffer_params else 2),
                                      16 << 20)))

        out_p = pl.pallas_call(
            kernel,
            out_shape=jax.ShapeDtypeStruct((M_pad, pdims[-1]), jnp.float32),
            grid_spec=pltpu.PrefetchScalarGridSpec(
                num_scalar_prefetch=0,
                grid=(n_tiles,),
                in_specs=in_specs,
                out_specs=out_spec,
            ),
            compiler_params=pltpu.CompilerParams(
                dimension_semantics=("parallel",),   # independent row tiles
                vmem_limit_bytes=vmem_limit,
            ),
            cost_estimate=pl.CostEstimate(
                flops=flops,
                transcendentals=transcendentals,
                bytes_accessed=bytes_accessed,
            ),
        )(x_p, *params)
        return jax.block_until_ready(out_p)

    try:
        out_p = run(True)
    except Exception:
        # Compatibility fallback if pipeline_mode=pl.Buffered(1) is unsupported.
        out_p = run(False)

    # Strip row / feature padding.
    return out_p[:M, :dim_out]


if __name__ == "__main__":
    # Small deterministic MLP: dims = (32, 64, 16), batch = 8.
    # forward: Linear(32->64) -> ReLU -> Linear(64->16) -> softmax(dim=1)
    dims = (32, 64, 16)
    batch = 8

    key = jax.random.PRNGKey(0)
    kx, k1, k2, k3, k4 = jax.random.split(key, 5)

    x = jax.random.normal(kx, (batch, dims[0]), dtype=jnp.float32)
    # PyTorch nn.Linear layout: weight (out, in), bias (out,)
    w1 = jax.random.normal(k1, (dims[1], dims[0]), dtype=jnp.float32) * 0.05
    b1 = jax.random.normal(k2, (dims[1],), dtype=jnp.float32) * 0.05
    w2 = jax.random.normal(k3, (dims[2], dims[1]), dtype=jnp.float32) * 0.05
    b2 = jax.random.normal(k4, (dims[2],), dtype=jnp.float32) * 0.05

    # One-time parameter packing (transpose + pad + bf16 cast), then forward.
    packed = pack_mlp_params([w1, w2], [b1, b2], use_bf16_matmul=True)
    out = mlp_forward(x, packed)
    out = jax.block_until_ready(out)

    # Pure-JAX f32 reference of the PyTorch module.
    h = jnp.maximum(x @ w1.T + b1, 0.0)
    y = h @ w2.T + b2
    ref = jax.nn.softmax(y, axis=1)          # dim_out = 16 > 1

    assert out.shape == ref.shape, f"shape mismatch {out.shape} vs {ref.shape}"
    # bf16 MXU feed + approx reciprocal -> relaxed tolerance vs the f32 reference.
    err = jnp.max(jnp.abs(out - ref))
    assert jnp.allclose(out, ref, atol=2e-2, rtol=2e-2), f"mismatch, max err={err}"

    print("KERNEL_OK")
</pallas_src>

<mosaic_0001>
module attributes {stable_mosaic.version = 11 : i64} {
  func.func @kernel(%arg0: i32, %arg1: memref<8x128xbf16, #tpu.memory_space<vmem>>, %arg2: memref<128x128xbf16, #tpu.memory_space<vmem>>, %arg3: memref<1x128xf32, #tpu.memory_space<vmem>>, %arg4: memref<128x128xbf16, #tpu.memory_space<vmem>>, %arg5: memref<1x128xf32, #tpu.memory_space<vmem>>, %arg6: memref<8x128xf32, #tpu.memory_space<vmem>>) attributes {dimension_semantics = [#tpu.dimension_semantics<parallel>], iteration_bounds = array<i64: 1>, scalar_prefetch = 0 : i64, scratch_operands = 0 : i64, tpu.core_type = #tpu.core_type<tc>, window_params = [{transform_indices = @transform_0, window_bounds = array<i64: 8, 128>}, {pipeline_mode = #tpu.pipeline_mode<synchronous>, transform_indices = @transform_1, window_bounds = array<i64: 128, 128>}, {pipeline_mode = #tpu.pipeline_mode<synchronous>, transform_indices = @transform_2, window_bounds = array<i64: 1, 128>}, {pipeline_mode = #tpu.pipeline_mode<synchronous>, transform_indices = @transform_3, window_bounds = array<i64: 128, 128>}, {pipeline_mode = #tpu.pipeline_mode<synchronous>, transform_indices = @transform_4, window_bounds = array<i64: 1, 128>}, {transform_indices = @transform_5, window_bounds = array<i64: 8, 128>}]} {
    %c0 = arith.constant 0 : index
    %c0_0 = arith.constant 0 : index
    %0 = vector.load %arg1[%c0, %c0_0] : memref<8x128xbf16, #tpu.memory_space<vmem>>, vector<8x128xbf16>
    %c0_1 = arith.constant 0 : index
    %c0_2 = arith.constant 0 : index
    %1 = vector.load %arg2[%c0_1, %c0_2] : memref<128x128xbf16, #tpu.memory_space<vmem>>, vector<128x128xbf16>
    %cst = arith.constant dense<0.000000e+00> : vector<8x128xf32>
    %2 = tpu.matmul %0, %1, %cst {dimension_numbers = #tpu.dot_dimension_numbers<[1], [0], [0], [1], [0, 0, 1, 1], [], []>} : vector<8x128xbf16>, vector<128x128xbf16>, vector<8x128xf32> -> vector<8x128xf32>
    %c0_3 = arith.constant 0 : index
    %c0_4 = arith.constant 0 : index
    %3 = vector.load %arg3[%c0_3, %c0_4] : memref<1x128xf32, #tpu.memory_space<vmem>>, vector<1x128xf32>
    %4 = vector.broadcast %3 : vector<1x128xf32> to vector<8x128xf32>
    %5 = arith.addf %2, %4 : vector<8x128xf32>
    %cst_5 = arith.constant 0.000000e+00 : f32
    %6 = vector.broadcast %cst_5 : f32 to vector<8x128xf32>
    %7 = arith.maximumf %5, %6 : vector<8x128xf32>
    %8 = arith.truncf %7 : vector<8x128xf32> to vector<8x128xbf16>
    %c0_6 = arith.constant 0 : index
    %c0_7 = arith.constant 0 : index
    %9 = vector.load %arg4[%c0_6, %c0_7] : memref<128x128xbf16, #tpu.memory_space<vmem>>, vector<128x128xbf16>
    %cst_8 = arith.constant dense<0.000000e+00> : vector<8x128xf32>
    %10 = tpu.matmul %8, %9, %cst_8 {dimension_numbers = #tpu.dot_dimension_numbers<[1], [0], [0], [1], [0, 0, 1, 1], [], []>} : vector<8x128xbf16>, vector<128x128xbf16>, vector<8x128xf32> -> vector<8x128xf32>
    %c0_9 = arith.constant 0 : index
    %c0_10 = arith.constant 0 : index
    %11 = vector.load %arg5[%c0_9, %c0_10] : memref<1x128xf32, #tpu.memory_space<vmem>>, vector<1x128xf32>
    %12 = vector.broadcast %11 : vector<1x128xf32> to vector<8x128xf32>
    %13 = arith.addf %10, %12 : vector<8x128xf32>
    %14 = tpu.iota {dimensions = array<i32: 1>} : vector<8x128xi32>
    %c16_i32 = arith.constant 16 : i32
    %15 = vector.broadcast %c16_i32 : i32 to vector<8x128xi32>
    %16 = arith.cmpi slt, %14, %15 : vector<8x128xi32>
    %cst_11 = arith.constant -1.000000e+30 : f32
    %17 = vector.broadcast %cst_11 : f32 to vector<8x128xf32>
    %18 = arith.select %16, %13, %17 : vector<8x128xi1>, vector<8x128xf32>
    %cst_12 = arith.constant dense<0xFF800000> : vector<8xf32>
    %19 = vector.multi_reduction <maximumf>, %18, %cst_12 [1] : vector<8x128xf32> to vector<8xf32>
    %20 = vector.shape_cast %19 : vector<8xf32> to vector<8x1xf32>
    %21 = vector.broadcast %20 : vector<8x1xf32> to vector<8x128xf32>
    %22 = arith.subf %18, %21 : vector<8x128xf32>
    %23 = math.exp %22 : vector<8x128xf32>
    %cst_13 = arith.constant dense<0.000000e+00> : vector<8xf32>
    %24 = vector.multi_reduction <add>, %23, %cst_13 [1] : vector<8x128xf32> to vector<8xf32>
    %25 = vector.shape_cast %24 : vector<8xf32> to vector<8x1xf32>
    %26 = tpu.reciprocal %25 {approx = true} : vector<8x1xf32> -> vector<8x1xf32>
    %27 = vector.broadcast %26 : vector<8x1xf32> to vector<8x128xf32>
    %28 = arith.mulf %23, %27 : vector<8x128xf32>
    %c0_14 = arith.constant 0 : index
    %c0_15 = arith.constant 0 : index
    %29 = vector.load %arg6[%c0_14, %c0_15] : memref<8x128xf32, #tpu.memory_space<vmem>>, vector<8x128xf32>
    tpu.vector_store %arg6[%c0_14, %c0_15], %28 {strides = array<i32>} : memref<8x128xf32, #tpu.memory_space<vmem>>, vector<8x128xf32>,
    return
  }
  func.func @transform_0(%arg0: i32) -> (i32, i32) {
    %c0_i32 = arith.constant 0 : i32
    %c0_i32_0 = arith.constant 0 : i32
    return %arg0, %c0_i32 : i32, i32
  }
  func.func @transform_1(%arg0: i32) -> (i32, i32) {
    %c0_i32 = arith.constant 0 : i32
    %c0_i32_0 = arith.constant 0 : i32
    %c0_i32_1 = arith.constant 0 : i32
    return %c0_i32, %c0_i32_0 : i32, i32
  }
  func.func @transform_2(%arg0: i32) -> (i32, i32) {
    %c0_i32 = arith.constant 0 : i32
    %c0_i32_0 = arith.constant 0 : i32
    %c0_i32_1 = arith.constant 0 : i32
    return %c0_i32, %c0_i32_0 : i32, i32
  }
  func.func @transform_3(%arg0: i32) -> (i32, i32) {
    %c0_i32 = arith.constant 0 : i32
    %c0_i32_0 = arith.constant 0 : i32
    %c0_i32_1 = arith.constant 0 : i32
    return %c0_i32, %c0_i32_0 : i32, i32
  }
  func.func @transform_4(%arg0: i32) -> (i32, i32) {
    %c0_i32 = arith.constant 0 : i32
    %c0_i32_0 = arith.constant 0 : i32
    %c0_i32_1 = arith.constant 0 : i32
    return %c0_i32, %c0_i32_0 : i32, i32
  }
  func.func @transform_5(%arg0: i32) -> (i32, i32) {
    %c0_i32 = arith.constant 0 : i32
    %c0_i32_0 = arith.constant 0 : i32
    return %arg0, %c0_i32 : i32, i32
  }
}

module attributes {stable_mosaic.version = 11 : i64} {
  func.func @kernel(%arg0: i32, %arg1: memref<8x128xbf16, #tpu.memory_space<vmem>>, %arg2: memref<128x128xbf16, #tpu.memory_space<vmem>>, %arg3: memref<1x128xf32, #tpu.memory_space<vmem>>, %arg4: memref<128x128xbf16, #tpu.memory_space<vmem>>, %arg5: memref<1x128xf32, #tpu.memory_space<vmem>>, %arg6: memref<8x128xf32, #tpu.memory_space<vmem>>) attributes {dimension_semantics = [#tpu.dimension_semantics<parallel>], iteration_bounds = array<i64: 1>, scalar_prefetch = 0 : i64, scratch_operands = 0 : i64, tpu.core_type = #tpu.core_type<tc>, window_params = [{transform_indices = @transform_0, window_bounds = array<i64: 8, 128>}, {pipeline_mode = #tpu.pipeline_mode<synchronous>, transform_indices = @transform_1, window_bounds = array<i64: 128, 128>}, {pipeline_mode = #tpu.pipeline_mode<synchronous>, transform_indices = @transform_2, window_bounds = array<i64: 1, 128>}, {pipeline_mode = #tpu.pipeline_mode<synchronous>, transform_indices = @transform_3, window_bounds = array<i64: 128, 128>}, {pipeline_mode = #tpu.pipeline_mode<synchronous>, transform_indices = @transform_4, window_bounds = array<i64: 1, 128>}, {transform_indices = @transform_5, window_bounds = array<i64: 8, 128>}]} {
    %c0 = arith.constant 0 : index
    %c0_0 = arith.constant 0 : index
    %0 = vector.load %arg1[%c0, %c0_0] : memref<8x128xbf16, #tpu.memory_space<vmem>>, vector<8x128xbf16>
    %c0_1 = arith.constant 0 : index
    %c0_2 = arith.constant 0 : index
    %1 = vector.load %arg2[%c0_1, %c0_2] : memref<128x128xbf16, #tpu.memory_space<vmem>>, vector<128x128xbf16>
    %cst = arith.constant dense<0.000000e+00> : vector<8x128xf32>
    %2 = tpu.matmul %0, %1, %cst {dimension_numbers = #tpu.dot_dimension_numbers<[1], [0], [0], [1], [0, 0, 1, 1], [], []>} : vector<8x128xbf16>, vector<128x128xbf16>, vector<8x128xf32> -> vector<8x128xf32>
    %c0_3 = arith.constant 0 : index
    %c0_4 = arith.constant 0 : index
    %3 = vector.load %arg3[%c0_3, %c0_4] : memref<1x128xf32, #tpu.memory_space<vmem>>, vector<1x128xf32>
    %4 = vector.broadcast %3 : vector<1x128xf32> to vector<8x128xf32>
    %5 = arith.addf %2, %4 : vector<8x128xf32>
    %cst_5 = arith.constant 0.000000e+00 : f32
    %6 = vector.broadcast %cst_5 : f32 to vector<8x128xf32>
    %7 = arith.maximumf %5, %6 : vector<8x128xf32>
    %8 = arith.truncf %7 : vector<8x128xf32> to vector<8x128xbf16>
    %c0_6 = arith.constant 0 : index
    %c0_7 = arith.constant 0 : index
    %9 = vector.load %arg4[%c0_6, %c0_7] : memref<128x128xbf16, #tpu.memory_space<vmem>>, vector<128x128xbf16>
    %cst_8 = arith.constant dense<0.000000e+00> : vector<8x128xf32>
    %10 = tpu.matmul %8, %9, %cst_8 {dimension_numbers = #tpu.dot_dimension_numbers<[1], [0], [0], [1], [0, 0, 1, 1], [], []>} : vector<8x128xbf16>, vector<128x128xbf16>, vector<8x128xf32> -> vector<8x128xf32>
    %c0_9 = arith.constant 0 : index
    %c0_10 = arith.constant 0 : index
    %11 = vector.load %arg5[%c0_9, %c0_10] : memref<1x128xf32, #tpu.memory_space<vmem>>, vector<1x128xf32>
    %12 = vector.broadcast %11 : vector<1x128xf32> to vector<8x128xf32>
    %13 = arith.addf %10, %12 : vector<8x128xf32>
    %14 = tpu.iota {dimensions = array<i32: 1>} : vector<8x128xi32>
    %c16_i32 = arith.constant 16 : i32
    %15 = vector.broadcast %c16_i32 : i32 to vector<8x128xi32>
    %16 = arith.cmpi slt, %14, %15 : vector<8x128xi32>
    %cst_11 = arith.constant -1.000000e+30 : f32
    %17 = vector.broadcast %cst_11 : f32 to vector<8x128xf32>
    %18 = arith.select %16, %13, %17 : vector<8x128xi1>, vector<8x128xf32>
    %cst_12 = arith.constant dense<0xFF800000> : vector<8xf32>
    %19 = vector.multi_reduction <maximumf>, %18, %cst_12 [1] : vector<8x128xf32> to vector<8xf32>
    %20 = vector.shape_cast %19 : vector<8xf32> to vector<8x1xf32>
    %21 = vector.broadcast %20 : vector<8x1xf32> to vector<8x128xf32>
    %22 = arith.subf %18, %21 : vector<8x128xf32>
    %23 = math.exp %22 : vector<8x128xf32>
    %cst_13 = arith.constant dense<0.000000e+00> : vector<8xf32>
    %24 = vector.multi_reduction <add>, %23, %cst_13 [1] : vector<8x128xf32> to vector<8xf32>
    %25 = vector.shape_cast %24 : vector<8xf32> to vector<8x1xf32>
    %26 = tpu.reciprocal %25 {approx = true} : vector<8x1xf32> -> vector<8x1xf32>
    %27 = vector.broadcast %26 : vector<8x1xf32> to vector<8x128xf32>
    %28 = arith.mulf %23, %27 : vector<8x128xf32>
    %c0_14 = arith.constant 0 : index
    %c0_15 = arith.constant 0 : index
    %29 = vector.load %arg6[%c0_14, %c0_15] : memref<8x128xf32, #tpu.memory_space<vmem>>, vector<8x128xf32>
    tpu.vector_store %arg6[%c0_14, %c0_15], %28 {strides = array<i32>} : memref<8x128xf32, #tpu.memory_space<vmem>>, vector<8x128xf32>,
    return
  }
  func.func @transform_0(%arg0: i32) -> (i32, i32) {
    %c0_i32 = arith.constant 0 : i32
    %c0_i32_0 = arith.constant 0 : i32
    return %arg0, %c0_i32 : i32, i32
  }
  func.func @transform_1(%arg0: i32) -> (i32, i32) {
    %c0_i32 = arith.constant 0 : i32
    %c0_i32_0 = arith.constant 0 : i32
    %c0_i32_1 = arith.constant 0 : i32
    return %c0_i32, %c0_i32_0 : i32, i32
  }
  func.func @transform_2(%arg0: i32) -> (i32, i32) {
    %c0_i32 = arith.constant 0 : i32
    %c0_i32_0 = arith.constant 0 : i32
    %c0_i32_1 = arith.constant 0 : i32
    return %c0_i32, %c0_i32_0 : i32, i32
  }
  func.func @transform_3(%arg0: i32) -> (i32, i32) {
    %c0_i32 = arith.constant 0 : i32
    %c0_i32_0 = arith.constant 0 : i32
    %c0_i32_1 = arith.constant 0 : i32
    return %c0_i32, %c0_i32_0 : i32, i32
  }
  func.func @transform_4(%arg0: i32) -> (i32, i32) {
    %c0_i32 = arith.constant 0 : i32
    %c0_i32_0 = arith.constant 0 : i32
    %c0_i32_1 = arith.constant 0 : i32
    return %c0_i32, %c0_i32_0 : i32, i32
  }
  func.func @transform_5(%arg0: i32) -> (i32, i32) {
    %c0_i32 = arith.constant 0 : i32
    %c0_i32_0 = arith.constant 0 : i32
    return %arg0, %c0_i32 : i32, i32
  }
}

</mosaic_0001>

<bundles_post_ra>
// kernel: tpu_custom_call.1
= control target key start
LH: loop header
LB: loop body
LE: loop exit
PB: predicated region body
PF: predicated region fallthrough
CT: control target
= control target key end

     0   :  { %10 = vsyncpa [#allocation3], 0  ;;  %s612_s0 = inlined_call_operand.hbm [shape: bf16[8,128], index: 0, kind: input, shape index: {}]   ;;  %s613_s1 = inlined_call_operand.hbm [shape: bf16[128,128], index: 1, kind: input, shape index: {}]   ;;  %s614_s2 = inlined_call_operand.vmem [shape: f32[1,128], index: 2, kind: input, shape index: {}]   ;;  %s615_s3 = inlined_call_operand.hbm [shape: bf16[128,128], index: 3, kind: input, shape index: {}]   ;;  %s616_s4 = inlined_call_operand.vmem [shape: f32[1,128], index: 4, kind: input, shape index: {}]   ;;  %s617_s5 = inlined_call_operand.hbm [shape: f32[8,128], index: 5, kind: output, shape index: {}]  }
   0x1   :  { %11 = vsyncpa [#allocation6], 0 }
   0x2   :  { %12 = vsyncpa [#allocation4], 0  ;;  %s514_s18 = smov [#allocation5]   ;;  %s420_s22 = scalar_lea.hbm %s613_s1, 1024 }
   0x3   :  { %s28_s19 = sshll.u32 %s514_s18, 4  ;;  %p421_p0 = scmp.ne.s32.totalorder %s613_s1, %s420_s22  ;;  %s29_s19 = int_to_ptr.vmem [resolvable:$true] %s28_s19 }
   0x4   :  { %p424_p1 = scmp.lt.u32.totalorder %s420_s22, %s613_s1 }
   0x6   :  { %p426_p2 = pnand %p424_p1, %p421_p0 }
   0x8   :  { %429 = shalt.err (!%p426_p2)
}
   0x9   :  { %s430_s27 = scalar_lea.vmem %s29_s19, 1024  ;;  %p435_p4 = scmp.lt.s32.totalorder %s29_s19, %s29_s19 }
   0xa   :  { %p431_p3 = scmp.ne.s32.totalorder %s29_s19, %s430_s27  ;;  %p436_p5 = scmp.lt.s32.totalorder %s430_s27, %s430_s27 }
   0xc   :  { %p437_p6 = por %p436_p5, %p435_p4 }
   0xe   :  { %p438_p7 = pnand %p437_p6, %p431_p3 }
  0x10   :  { %441 = shalt.err (!%p438_p7)
}
  0x11   :  { %s515_s28 = smov 64   ;;  %s516_s29 = smov 4  }
  0x12   :  { %34 = dma.hbm_to_vmem [thread:$0]  %s613_s1, 1024, %s29_s19, [#allocation6], %s515_s28, %s515_s28, %s516_s29  }
  0x13   :  { %s517_s7 = smov [#allocation2]   ;;  %s518_s9 = smov [#allocation7]  }
  0x14   :  { %s19_s8 = sshll.u32 %s517_s7, 4  ;;  %s42_s10 = sshll.u32 %s518_s9, 4  ;;  %s20_s8 = int_to_ptr.vmem [resolvable:$true] %s19_s8  ;;  %s43_s10 = int_to_ptr.vmem [resolvable:$true] %s42_s10 }
  0x15   :  { %s442_s13 = scalar_lea.hbm %s612_s0, 64 }
  0x16   :  { %p443_p8 = scmp.ne.s32.totalorder %s612_s0, %s442_s13  ;;  %p446_p9 = scmp.lt.u32.totalorder %s442_s13, %s612_s0 }
  0x18   :  { %p448_p10 = pnand %p446_p9, %p443_p8 }
  0x1a   :  { %451 = shalt.err (!%p448_p10)
}
  0x1b   :  { %s452_s1 = scalar_lea.vmem %s20_s8, 64  ;;  %p457_p12 = scmp.lt.s32.totalorder %s20_s8, %s20_s8 }
  0x1c   :  { %p453_p11 = scmp.ne.s32.totalorder %s20_s8, %s452_s1  ;;  %p458_p13 = scmp.lt.s32.totalorder %s452_s1, %s452_s1 }
  0x1e   :  { %p459_p0 = por %p458_p13, %p457_p12 }
  0x20   :  { %p460_p1 = pnand %p459_p0, %p453_p11 }
  0x22   :  { %463 = shalt.err (!%p460_p1)
}
  0x23   :  { %22 = dma.hbm_to_vmem [thread:$0]  %s612_s0, 64, %s20_s8, [#allocation3]  }
  0x24   :  { %s464_s22 = scalar_lea.hbm %s615_s3, 1024 }
  0x25   :  { %p465_p2 = scmp.ne.s32.totalorder %s615_s3, %s464_s22  ;;  %p468_p3 = scmp.lt.u32.totalorder %s464_s22, %s615_s3 }
  0x27   :  { %p470_p4 = pnand %p468_p3, %p465_p2 }
  0x29   :  { %473 = shalt.err (!%p470_p4)
}
  0x2a   :  { %s474_s27 = scalar_lea.vmem %s43_s10, 1024  ;;  %p479_p6 = scmp.lt.s32.totalorder %s43_s10, %s43_s10 }
  0x2b   :  { %p475_p5 = scmp.ne.s32.totalorder %s43_s10, %s474_s27  ;;  %p480_p7 = scmp.lt.s32.totalorder %s474_s27, %s474_s27 }
  0x2d   :  { %p481_p8 = por %p480_p7, %p479_p6 }
  0x2f   :  { %p482_p9 = pnand %p481_p8, %p475_p5 }
  0x31   :  { %485 = shalt.err (!%p482_p9)
}
  0x32   :  { %48 = dma.hbm_to_vmem [thread:$0]  %s615_s3, 1024, %s43_s10, [#allocation6], %s515_s28, %s515_s28, %s516_s29  }
  0x33   :  { %508 = dma.done.wait [#allocation3], 64  }
  0x34   :  { %509 = vsyncadd [#allocation3], 4294967232 }
  0x35   :  { %510 = dma.done.wait [#allocation6], 2048  }
  0x36   :  { %511 = vsyncadd [#allocation6], 4294965248  ;;  %v519_v0 = vmov 0.0   ;;  %vm520_vm0 = vmmov 0   ;;  %v400_v1 = vld [vmem:[#allocation5] sm:$0xff]   ;;  %v401_v2 = vld [vmem:[#allocation5 + $0x8] sm:$0xff]   ;;  %v286_v26 = vlaneseq }
  0x37   :  { %352 = vmatprep.subr.bf16.mxu0 %v519_v0  ;;  %368 = vmatprep.mubr.msk.bf16.mxu0 %vm520_vm0, %v519_v0  ;;  %v402_v3 = vld [vmem:[#allocation5 + $0x10] sm:$0xff]   ;;  %v408_v4 = vld [vmem:[#allocation7] sm:$0xff]   ;;  %v403_v5 = vld [vmem:[#allocation5 + $0x18] sm:$0xff]  }
  0x38   :  { %372 = vmatprep.subr.bf16.mxu1 %v519_v0  ;;  %388 = vmatprep.mubr.msk.bf16.mxu1 %vm520_vm0, %v519_v0  ;;  %v409_v6 = vld [vmem:[#allocation7 + $0x8] sm:$0xff]   ;;  %v404_v7 = vld [vmem:[#allocation5 + $0x20] sm:$0xff]   ;;  %v410_v8 = vld [vmem:[#allocation7 + $0x10] sm:$0xff]   ;;  %v287_v27 = vand.u32 127, %v286_v26 }
  0x39   :  { %353 = vmatpush3.bf16.msra.mxu0 %v400_v1  ;;  %373 = vmatpush3.bf16.msra.mxu1 %v408_v4  ;;  %v405_v9 = vld [vmem:[#allocation5 + $0x28] sm:$0xff]   ;;  %v411_v10 = vld [vmem:[#allocation7 + $0x18] sm:$0xff]   ;;  %v406_v11 = vld [vmem:[#allocation5 + $0x30] sm:$0xff]  }
  0x3a   :  { %354 = vmatprep.subr.bf16.mxu0 %v519_v0  ;;  %374 = vmatprep.subr.bf16.mxu1 %v519_v0  ;;  %v412_v12 = vld [vmem:[#allocation7 + $0x20] sm:$0xff]   ;;  %v407_v13 = vld [vmem:[#allocation5 + $0x38] sm:$0xff]   ;;  %v413_v14 = vld [vmem:[#allocation7 + $0x28] sm:$0xff]   ;;  %vm288_vm1 = vcmp.lt.s32.totalorder %v287_v27, 16 }
  0x3b   :  { %v61_v15 = vld [vmem:[#allocation2] sm:$0xf]  ;;  %v414_v16 = vld [vmem:[#allocation7 + $0x30] sm:$0xff]  }
  0x3c   :  { %v415_v17 = vld [vmem:[#allocation7 + $0x38] sm:$0xff]  }
  0x3d   :  { %355 = vmatpush3.bf16.msra.mxu0 %v401_v2  ;;  %375 = vmatpush3.bf16.msra.mxu1 %v409_v6  ;;  %v316_v18 = vld [vmem:[%s614_s2] ss:$0 sm:$0xff]  ;;  %s521_s2 = smov [#allocation8]  }
  0x3e   :  { %356 = vmatprep.subr.bf16.mxu0 %v519_v0  ;;  %376 = vmatprep.subr.bf16.mxu1 %v519_v0  ;;  %v325_v28 = vld [vmem:[%s616_s4] ss:$0 sm:$0xff]  ;;  %s306_s7 = sshll.u32 %s521_s2, 4  ;;  %s307_s7 = int_to_ptr.vmem [resolvable:$true] %s306_s7 }
  0x3f   :  { %s486_s4 = scalar_lea.vmem %s307_s7, 128  ;;  %p491_p11 = scmp.lt.s32.totalorder %s307_s7, %s307_s7 }
  0x40   :  { %p487_p10 = scmp.ne.s32.totalorder %s307_s7, %s486_s4  ;;  %p492_p12 = scmp.lt.s32.totalorder %s486_s4, %s486_s4 }
  0x41   :  { %357 = vmatpush3.bf16.msra.mxu0 %v402_v3  ;;  %377 = vmatpush3.bf16.msra.mxu1 %v410_v8 }
  0x42   :  { %358 = vmatprep.subr.bf16.mxu0 %v519_v0  ;;  %378 = vmatprep.subr.bf16.mxu1 %v519_v0  ;;  %p493_p13 = por %p492_p12, %p491_p11 }
  0x44   :  { %p494_p0 = pnand %p493_p13, %p487_p10 }
  0x45   :  { %359 = vmatpush3.bf16.msra.mxu0 %v403_v5  ;;  %379 = vmatpush3.bf16.msra.mxu1 %v411_v10 }
  0x46   :  { %360 = vmatprep.subr.bf16.mxu0 %v519_v0  ;;  %380 = vmatprep.subr.bf16.mxu1 %v519_v0 }
  0x49   :  { %361 = vmatpush3.bf16.msra.mxu0 %v404_v7  ;;  %381 = vmatpush3.bf16.msra.mxu1 %v412_v12 }
  0x4a   :  { %362 = vmatprep.subr.bf16.mxu0 %v519_v0  ;;  %382 = vmatprep.subr.bf16.mxu1 %v519_v0 }
  0x4d   :  { %363 = vmatpush3.bf16.msra.mxu0 %v405_v9  ;;  %383 = vmatpush3.bf16.msra.mxu1 %v413_v14 }
  0x4e   :  { %364 = vmatprep.subr.bf16.mxu0 %v519_v0  ;;  %384 = vmatprep.subr.bf16.mxu1 %v519_v0 }
  0x51   :  { %365 = vmatpush3.bf16.msra.mxu0 %v406_v11  ;;  %385 = vmatpush3.bf16.msra.mxu1 %v414_v16 }
  0x52   :  { %366 = vmatprep.subr.bf16.mxu0 %v519_v0  ;;  %386 = vmatprep.subr.bf16.mxu1 %v519_v0 }
  0x55   :  { %367 = vmatpush3.bf16.msra.mxu0 %v407_v13  ;;  %387 = vmatpush3.bf16.msra.mxu1 %v415_v17 }
  0x58   :  { %369 = vmatmul.mubr.bf16.vlgmr.msra.gmra.mrb[0].mxu0 %v61_v15 }
 0x12b   :  { %v167_v19 = vpop.f32.mrb[0].mxu0 }
 0x12c   :  { %v168_v20 = vadd.f32 %v316_v18, %v167_v19  ;;  %v370_v21 = vpop.f32.mrb[1].mxu0 }
 0x12d   :  { %v170_v22 = vpop.f32.mrb[2].mxu0 }
 0x12e   :  { %v173_v23 = vmax.f32 %v168_v20, 0.0  ;;  %v371_v24 = vpop.f32.mrb[3].mxu0 }
 0x130   :  { %v174_v25 = vpack.c.bf16 %v173_v23, %v173_v23 }
 0x132   :  { %389 = vmatmul.mubr.bf16.vlgmr.msra.gmra.mrb[0].mxu1 %v174_v25 }
 0x205   :  { %v280_v29 = vpop.f32.mrb[0].mxu1 }
 0x206   :  { %v281_v30 = vadd.f32 %v325_v28, %v280_v29  ;;  %v390_v31 = vpop.f32.mrb[1].mxu1 }
 0x207   :  { %v283_v32 = vpop.f32.mrb[2].mxu1 }
 0x208   :  { %v391_v33 = vpop.f32.mrb[3].mxu1  ;;  %v289_v34 = vsel %vm288_vm1, %v281_v30, -1e+30 }
 0x209   :  { %290 = vmax.xlane.f32.xlu0 %v289_v34 }
 0x296   :  { %v291_v35 = vpop.xlane.xlu0 %290 }
 0x297   :  { %v292_v36 = vsub.f32 %v289_v34, %v291_v35 }
 0x299   :  { %v293_v37 = vmul.f32 1.442695, %v292_v36 }
 0x29b   :  { %416 = vpow2.f32 %v293_v37 }
 0x2a5   :  { %v417_v38 = vpop.eup %416 }
 0x2a6   :  { %295 = vadd.xlane.f32.xlu0 %v417_v38 }
 0x333   :  { %v296_v39 = vpop.xlane.xlu0 %295 }
 0x334   :  { %418 = vrcp.f32 %v296_v39 }
 0x33e   :  { %v419_v40 = vpop.eup %418 }
 0x33f   :  { %v298_v41 = vmul.f32 %v419_v40, %v417_v38 }
 0x341   :  { %299 = vst [vmem:[#allocation8] sm:$0xff] %v298_v41 }
 0x342   :  { %497 = shalt.err (!%p494_p0)
}
 0x343   :  { %s498_s10 = scalar_lea.hbm %s617_s5, 128 }
 0x344   :  { %p499_p1 = scmp.ne.s32.totalorder %s617_s5, %s498_s10  ;;  %p502_p2 = scmp.lt.u32.totalorder %s498_s10, %s617_s5 }
 0x346   :  { %p504_p3 = pnand %p502_p2, %p499_p1 }
 0x348   :  { %507 = shalt.err (!%p504_p3)
}
 0x349   :  { %309 = dma.vmem_to_hbm [thread:$0]  %s307_s7, 128, %s617_s5, [#allocation4]  }
 0x34a   :  { %512 = dma.done.wait [#allocation4], 128  }
 0x34b   :  { %513 = vsyncadd [#allocation4], 4294967168 }
 0x34c   :  { %313 = vsyncpa [#allocation3], 1 }
 0x34d   :  { %314 = vsyncpa [#allocation6], 1 }
 0x34e   :  { %315 = vsyncpa [#allocation4], 1 }

// kernel: tpu_custom_call.1
= control target key start
LH: loop header
LB: loop body
LE: loop exit
PB: predicated region body
PF: predicated region fallthrough
CT: control target
= control target key end

     0   :  { %10 = vsyncpa [#allocation3], 0  ;;  %s612_s0 = inlined_call_operand.hbm [shape: bf16[8,128], index: 0, kind: input, shape index: {}]   ;;  %s613_s1 = inlined_call_operand.hbm [shape: bf16[128,128], index: 1, kind: input, shape index: {}]   ;;  %s614_s2 = inlined_call_operand.vmem [shape: f32[1,128], index: 2, kind: input, shape index: {}]   ;;  %s615_s3 = inlined_call_operand.hbm [shape: bf16[128,128], index: 3, kind: input, shape index: {}]   ;;  %s616_s4 = inlined_call_operand.vmem [shape: f32[1,128], index: 4, kind: input, shape index: {}]   ;;  %s617_s5 = inlined_call_operand.hbm [shape: f32[8,128], index: 5, kind: output, shape index: {}]  }
   0x1   :  { %11 = vsyncpa [#allocation6], 0 }
   0x2   :  { %12 = vsyncpa [#allocation4], 0  ;;  %s514_s18 = smov [#allocation5]   ;;  %s420_s22 = scalar_lea.hbm %s613_s1, 1024 }
   0x3   :  { %s28_s19 = sshll.u32 %s514_s18, 4  ;;  %p421_p0 = scmp.ne.s32.totalorder %s613_s1, %s420_s22  ;;  %s29_s19 = int_to_ptr.vmem [resolvable:$true] %s28_s19 }
   0x4   :  { %p424_p1 = scmp.lt.u32.totalorder %s420_s22, %s613_s1 }
   0x6   :  { %p426_p2 = pnand %p424_p1, %p421_p0 }
   0x8   :  { %429 = shalt.err (!%p426_p2)
}
   0x9   :  { %s430_s27 = scalar_lea.vmem %s29_s19, 1024  ;;  %p435_p4 = scmp.lt.s32.totalorder %s29_s19, %s29_s19 }
   0xa   :  { %p431_p3 = scmp.ne.s32.totalorder %s29_s19, %s430_s27  ;;  %p436_p5 = scmp.lt.s32.totalorder %s430_s27, %s430_s27 }
   0xc   :  { %p437_p6 = por %p436_p5, %p435_p4 }
   0xe   :  { %p438_p7 = pnand %p437_p6, %p431_p3 }
  0x10   :  { %441 = shalt.err (!%p438_p7)
}
  0x11   :  { %s515_s28 = smov 64   ;;  %s516_s29 = smov 4  }
  0x12   :  { %34 = dma.hbm_to_vmem [thread:$0]  %s613_s1, 1024, %s29_s19, [#allocation6], %s515_s28, %s515_s28, %s516_s29  }
  0x13   :  { %s517_s7 = smov [#allocation2]   ;;  %s518_s9 = smov [#allocation7]  }
  0x14   :  { %s19_s8 = sshll.u32 %s517_s7, 4  ;;  %s42_s10 = sshll.u32 %s518_s9, 4  ;;  %s20_s8 = int_to_ptr.vmem [resolvable:$true] %s19_s8  ;;  %s43_s10 = int_to_ptr.vmem [resolvable:$true] %s42_s10 }
  0x15   :  { %s442_s13 = scalar_lea.hbm %s612_s0, 64 }
  0x16   :  { %p443_p8 = scmp.ne.s32.totalorder %s612_s0, %s442_s13  ;;  %p446_p9 = scmp.lt.u32.totalorder %s442_s13, %s612_s0 }
  0x18   :  { %p448_p10 = pnand %p446_p9, %p443_p8 }
  0x1a   :  { %451 = shalt.err (!%p448_p10)
}
  0x1b   :  { %s452_s1 = scalar_lea.vmem %s20_s8, 64  ;;  %p457_p12 = scmp.lt.s32.totalorder %s20_s8, %s20_s8 }
  0x1c   :  { %p453_p11 = scmp.ne.s32.totalorder %s20_s8, %s452_s1  ;;  %p458_p13 = scmp.lt.s32.totalorder %s452_s1, %s452_s1 }
  0x1e   :  { %p459_p0 = por %p458_p13, %p457_p12 }
  0x20   :  { %p460_p1 = pnand %p459_p0, %p453_p11 }
  0x22   :  { %463 = shalt.err (!%p460_p1)
}
  0x23   :  { %22 = dma.hbm_to_vmem [thread:$0]  %s612_s0, 64, %s20_s8, [#allocation3]  }
  0x24   :  { %s464_s22 = scalar_lea.hbm %s615_s3, 1024 }
  0x25   :  { %p465_p2 = scmp.ne.s32.totalorder %s615_s3, %s464_s22  ;;  %p468_p3 = scmp.lt.u32.totalorder %s464_s22, %s615_s3 }
  0x27   :  { %p470_p4 = pnand %p468_p3, %p465_p2 }
  0x29   :  { %473 = shalt.err (!%p470_p4)
}
  0x2a   :  { %s474_s27 = scalar_lea.vmem %s43_s10, 1024  ;;  %p479_p6 = scmp.lt.s32.totalorder %s43_s10, %s43_s10 }
  0x2b   :  { %p475_p5 = scmp.ne.s32.totalorder %s43_s10, %s474_s27  ;;  %p480_p7 = scmp.lt.s32.totalorder %s474_s27, %s474_s27 }
  0x2d   :  { %p481_p8 = por %p480_p7, %p479_p6 }
  0x2f   :  { %p482_p9 = pnand %p481_p8, %p475_p5 }
  0x31   :  { %485 = shalt.err (!%p482_p9)
}
  0x32   :  { %48 = dma.hbm_to_vmem [thread:$0]  %s615_s3, 1024, %s43_s10, [#allocation6], %s515_s28, %s515_s28, %s516_s29  }
  0x33   :  { %508 = dma.done.wait [#allocation3], 64  }
  0x34   :  { %509 = vsyncadd [#allocation3], 4294967232 }
  0x35   :  { %510 = dma.done.wait [#allocation6], 2048  }
  0x36   :  { %511 = vsyncadd [#allocation6], 4294965248  ;;  %v519_v0 = vmov 0.0   ;;  %vm520_vm0 = vmmov 0   ;;  %v400_v1 = vld [vmem:[#allocation5] sm:$0xff]   ;;  %v401_v2 = vld [vmem:[#allocation5 + $0x8] sm:$0xff]   ;;  %v286_v26 = vlaneseq }
  0x37   :  { %352 = vmatprep.subr.bf16.mxu0 %v519_v0  ;;  %368 = vmatprep.mubr.msk.bf16.mxu0 %vm520_vm0, %v519_v0  ;;  %v402_v3 = vld [vmem:[#allocation5 + $0x10] sm:$0xff]   ;;  %v408_v4 = vld [vmem:[#allocation7] sm:$0xff]   ;;  %v403_v5 = vld [vmem:[#allocation5 + $0x18] sm:$0xff]  }
  0x38   :  { %372 = vmatprep.subr.bf16.mxu1 %v519_v0  ;;  %388 = vmatprep.mubr.msk.bf16.mxu1 %vm520_vm0, %v519_v0  ;;  %v409_v6 = vld [vmem:[#allocation7 + $0x8] sm:$0xff]   ;;  %v404_v7 = vld [vmem:[#allocation5 + $0x20] sm:$0xff]   ;;  %v410_v8 = vld [vmem:[#allocation7 + $0x10] sm:$0xff]   ;;  %v287_v27 = vand.u32 127, %v286_v26 }
  0x39   :  { %353 = vmatpush3.bf16.msra.mxu0 %v400_v1  ;;  %373 = vmatpush3.bf16.msra.mxu1 %v408_v4  ;;  %v405_v9 = vld [vmem:[#allocation5 + $0x28] sm:$0xff]   ;;  %v411_v10 = vld [vmem:[#allocation7 + $0x18] sm:$0xff]   ;;  %v406_v11 = vld [vmem:[#allocation5 + $0x30] sm:$0xff]  }
  0x3a   :  { %354 = vmatprep.subr.bf16.mxu0 %v519_v0  ;;  %374 = vmatprep.subr.bf16.mxu1 %v519_v0  ;;  %v412_v12 = vld [vmem:[#allocation7 + $0x20] sm:$0xff]   ;;  %v407_v13 = vld [vmem:[#allocation5 + $0x38] sm:$0xff]   ;;  %v413_v14 = vld [vmem:[#allocation7 + $0x28] sm:$0xff]   ;;  %vm288_vm1 = vcmp.lt.s32.totalorder %v287_v27, 16 }
  0x3b   :  { %v61_v15 = vld [vmem:[#allocation2] sm:$0xf]  ;;  %v414_v16 = vld [vmem:[#allocation7 + $0x30] sm:$0xff]  }
  0x3c   :  { %v415_v17 = vld [vmem:[#allocation7 + $0x38] sm:$0xff]  }
  0x3d   :  { %355 = vmatpush3.bf16.msra.mxu0 %v401_v2  ;;  %375 = vmatpush3.bf16.msra.mxu1 %v409_v6  ;;  %v316_v18 = vld [vmem:[%s614_s2] ss:$0 sm:$0xff]  ;;  %s521_s2 = smov [#allocation8]  }
  0x3e   :  { %356 = vmatprep.subr.bf16.mxu0 %v519_v0  ;;  %376 = vmatprep.subr.bf16.mxu1 %v519_v0  ;;  %v325_v28 = vld [vmem:[%s616_s4] ss:$0 sm:$0xff]  ;;  %s306_s7 = sshll.u32 %s521_s2, 4  ;;  %s307_s7 = int_to_ptr.vmem [resolvable:$true] %s306_s7 }
  0x3f   :  { %s486_s4 = scalar_lea.vmem %s307_s7, 128  ;;  %p491_p11 = scmp.lt.s32.totalorder %s307_s7, %s307_s7 }
  0x40   :  { %p487_p10 = scmp.ne.s32.totalorder %s307_s7, %s486_s4  ;;  %p492_p12 = scmp.lt.s32.totalorder %s486_s4, %s486_s4 }
  0x41   :  { %357 = vmatpush3.bf16.msra.mxu0 %v402_v3  ;;  %377 = vmatpush3.bf16.msra.mxu1 %v410_v8 }
  0x42   :  { %358 = vmatprep.subr.bf16.mxu0 %v519_v0  ;;  %378 = vmatprep.subr.bf16.mxu1 %v519_v0  ;;  %p493_p13 = por %p492_p12, %p491_p11 }
  0x44   :  { %p494_p0 = pnand %p493_p13, %p487_p10 }
  0x45   :  { %359 = vmatpush3.bf16.msra.mxu0 %v403_v5  ;;  %379 = vmatpush3.bf16.msra.mxu1 %v411_v10 }
  0x46   :  { %360 = vmatprep.subr.bf16.mxu0 %v519_v0  ;;  %380 = vmatprep.subr.bf16.mxu1 %v519_v0 }
  0x49   :  { %361 = vmatpush3.bf16.msra.mxu0 %v404_v7  ;;  %381 = vmatpush3.bf16.msra.mxu1 %v412_v12 }
  0x4a   :  { %362 = vmatprep.subr.bf16.mxu0 %v519_v0  ;;  %382 = vmatprep.subr.bf16.mxu1 %v519_v0 }
  0x4d   :  { %363 = vmatpush3.bf16.msra.mxu0 %v405_v9  ;;  %383 = vmatpush3.bf16.msra.mxu1 %v413_v14 }
  0x4e   :  { %364 = vmatprep.subr.bf16.mxu0 %v519_v0  ;;  %384 = vmatprep.subr.bf16.mxu1 %v519_v0 }
  0x51   :  { %365 = vmatpush3.bf16.msra.mxu0 %v406_v11  ;;  %385 = vmatpush3.bf16.msra.mxu1 %v414_v16 }
  0x52   :  { %366 = vmatprep.subr.bf16.mxu0 %v519_v0  ;;  %386 = vmatprep.subr.bf16.mxu1 %v519_v0 }
  0x55   :  { %367 = vmatpush3.bf16.msra.mxu0 %v407_v13  ;;  %387 = vmatpush3.bf16.msra.mxu1 %v415_v17 }
  0x58   :  { %369 = vmatmul.mubr.bf16.vlgmr.msra.gmra.mrb[0].mxu0 %v61_v15 }
 0x12b   :  { %v167_v19 = vpop.f32.mrb[0].mxu0 }
 0x12c   :  { %v168_v20 = vadd.f32 %v316_v18, %v167_v19  ;;  %v370_v21 = vpop.f32.mrb[1].mxu0 }
 0x12d   :  { %v170_v22 = vpop.f32.mrb[2].mxu0 }
 0x12e   :  { %v173_v23 = vmax.f32 %v168_v20, 0.0  ;;  %v371_v24 = vpop.f32.mrb[3].mxu0 }
 0x130   :  { %v174_v25 = vpack.c.bf16 %v173_v23, %v173_v23 }
 0x132   :  { %389 = vmatmul.mubr.bf16.vlgmr.msra.gmra.mrb[0].mxu1 %v174_v25 }
 0x205   :  { %v280_v29 = vpop.f32.mrb[0].mxu1 }
 0x206   :  { %v281_v30 = vadd.f32 %v325_v28, %v280_v29  ;;  %v390_v31 = vpop.f32.mrb[1].mxu1 }
 0x207   :  { %v283_v32 = vpop.f32.mrb[2].mxu1 }
 0x208   :  { %v391_v33 = vpop.f32.mrb[3].mxu1  ;;  %v289_v34 = vsel %vm288_vm1, %v281_v30, -1e+30 }
 0x209   :  { %290 = vmax.xlane.f32.xlu0 %v289_v34 }
 0x296   :  { %v291_v35 = vpop.xlane.xlu0 %290 }
 0x297   :  { %v292_v36 = vsub.f32 %v289_v34, %v291_v35 }
 0x299   :  { %v293_v37 = vmul.f32 1.442695, %v292_v36 }
 0x29b   :  { %416 = vpow2.f32 %v293_v37 }
 0x2a5   :  { %v417_v38 = vpop.eup %416 }
 0x2a6   :  { %295 = vadd.xlane.f32.xlu0 %v417_v38 }
 0x333   :  { %v296_v39 = vpop.xlane.xlu0 %295 }
 0x334   :  { %418 = vrcp.f32 %v296_v39 }
 0x33e   :  { %v419_v40 = vpop.eup %418 }
 0x33f   :  { %v298_v41 = vmul.f32 %v419_v40, %v417_v38 }
 0x341   :  { %299 = vst [vmem:[#allocation8] sm:$0xff] %v298_v41 }
 0x342   :  { %497 = shalt.err (!%p494_p0)
}
 0x343   :  { %s498_s10 = scalar_lea.hbm %s617_s5, 128 }
 0x344   :  { %p499_p1 = scmp.ne.s32.totalorder %s617_s5, %s498_s10  ;;  %p502_p2 = scmp.lt.u32.totalorder %s498_s10, %s617_s5 }
 0x346   :  { %p504_p3 = pnand %p502_p2, %p499_p1 }
 0x348   :  { %507 = shalt.err (!%p504_p3)
}
 0x349   :  { %309 = dma.vmem_to_hbm [thread:$0]  %s307_s7, 128, %s617_s5, [#allocation4]  }
 0x34a   :  { %512 = dma.done.wait [#allocation4], 128  }
 0x34b   :  { %513 = vsyncadd [#allocation4], 4294967168 }
 0x34c   :  { %313 = vsyncpa [#allocation3], 1 }
 0x34d   :  { %314 = vsyncpa [#allocation6], 1 }
 0x34e   :  { %315 = vsyncpa [#allocation4], 1 }

</bundles_post_ra>
